<compile_context>
chip_gen: v5e
topology: v5e:2x2
jax: 0.10.0
libtpu: 0.0.40
codegen_flags: <defaults>
</compile_context>

<pallas_src>
import jax
import jax.numpy as jnp
from jax.experimental import pallas as pl
from jax.experimental.pallas import tpu as pltpu

_LANES = 128
_TARGET_TILE_BYTES = 4 * 1024 * 1024   # ~4 MiB per tile (per-dtype row count derived from this)
_VMEM_LIMIT_BYTES = 40 * 1024 * 1024   # headroom for 2x double-buffered 4 MiB tiles + scratch


def _round_up(v, m):
    return -(-v // m) * m


def _make_golu_kernel(alpha, beta, gamma):
    """Build an elementwise GoLU kernel with compile-time scalar parameters."""
    alpha = float(alpha)
    beta = float(beta)
    gamma = float(gamma)
    a_is_one = alpha == 1.0
    b_is_one = beta == 1.0
    g_is_one = gamma == 1.0

    def kernel(x_ref, o_ref):
        z = x_ref[...]
        # exp(-gamma * z)                          (EUP)
        t = -z if g_is_one else z * (-gamma)
        inner = jnp.exp(t)
        # exp(-beta * exp(-gamma * z))             (EUP)
        arg = -inner if b_is_one else inner * (-beta)
        gate = jnp.exp(arg)
        # z * alpha * gate                         (VPU)
        out = z if a_is_one else z * alpha
        o_ref[...] = (out * gate).astype(o_ref.dtype)

    return kernel


def golu_reference(x, alpha=1.0, beta=1.0, gamma=1.0):
    """Pure-JAX reference matching _golu_forward in the PyTorch module."""
    a = jnp.asarray(alpha, dtype=x.dtype)
    b = jnp.asarray(beta, dtype=x.dtype)
    g = jnp.asarray(gamma, dtype=x.dtype)
    return x * a * jnp.exp(-b * jnp.exp(-g * x))


def _pick_tile_rows(rows, itemsize, target_tile_bytes):
    """Dtype-aware tile-row choice; guarantees >=2 (even) grid steps when non-trivial."""
    sub = max(8, 32 // itemsize)          # sublane packing: 8 (f32), 16 (bf16/f16), 32 (int8/fp8)
    budget_rows = max(sub, (target_tile_bytes // (_LANES * itemsize)) // sub * sub)
    if rows <= 2 * sub:
        # Tiny tensor: single full-array block (allowed even if rows % 8 != 0).
        return rows
    n_steps = max(2, pl.cdiv(rows, budget_rows))
    if n_steps % 2:
        n_steps += 1                       # even step count -> balanced halves on v7x megacore
    return min(rows, _round_up(pl.cdiv(rows, n_steps), sub))


def golu_forward(x, alpha=1.0, beta=1.0, gamma=1.0, *,
                 donate_input=False, target_tile_bytes=_TARGET_TILE_BYTES):
    """Apply GoLU elementwise to a tensor of any shape via a Pallas TPU kernel.

    Set donate_input=True only when the input buffer is dead after this call
    (e.g. a fused temp, or donated at the jit boundary); it lets the output
    reuse the input's HBM buffer via input_output_aliases.
    """
    orig_shape = x.shape
    dtype = x.dtype
    total = x.size
    if total == 0:
        return x

    itemsize = jnp.dtype(dtype).itemsize
    x_flat = x.reshape(-1)

    # Lane-aligned prefix runs through the kernel; a <128-element tail (rare:
    # numel % 128 != 0) is computed with the plain-JAX formula.  No full-tensor
    # pad/unpad passes are ever issued.
    tail = total % _LANES
    aligned = total - tail

    parts = []
    if aligned:
        rows = aligned // _LANES
        x_prefix = x_flat if tail == 0 else x_flat[:aligned]
        x2d = x_prefix.reshape(rows, _LANES)

        tile_rows = _pick_tile_rows(rows, itemsize, target_tile_bytes)
        grid = (pl.cdiv(rows, tile_rows),)   # ragged last row-block is masked by Pallas

        cost = pl.CostEstimate(
            flops=4 * aligned,
            transcendentals=2 * aligned,
            bytes_accessed=2 * aligned * itemsize,
        )

        out2d = pl.pallas_call(
            _make_golu_kernel(alpha, beta, gamma),
            out_shape=jax.ShapeDtypeStruct((rows, _LANES), dtype),
            grid_spec=pl.GridSpec(
                grid=grid,
                in_specs=[pl.BlockSpec((tile_rows, _LANES), lambda i: (i, 0))],
                out_specs=pl.BlockSpec((tile_rows, _LANES), lambda i: (i, 0)),
            ),
            compiler_params=pltpu.CompilerParams(
                dimension_semantics=("parallel",),
                vmem_limit_bytes=_VMEM_LIMIT_BYTES,
            ),
            cost_estimate=cost,
            input_output_aliases={0: 0} if donate_input else {},
        )(x2d)
        parts.append(out2d.reshape(-1))

    if tail:
        parts.append(golu_reference(x_flat[aligned:], alpha, beta, gamma))

    out_flat = parts[0] if len(parts) == 1 else jnp.concatenate(parts)
    return out_flat.reshape(orig_shape)


if __name__ == "__main__":
    key = jax.random.PRNGKey(0)
    k1, k2, k3, k4 = jax.random.split(key, 4)

    # 1) Module-default case on a small NCHW activation (single block, f32).
    x_small = jax.random.normal(k1, (2, 4, 16, 16), dtype=jnp.float32)
    out = jax.block_until_ready(golu_forward(x_small))
    ref = golu_reference(x_small)
    assert out.shape == x_small.shape and out.dtype == x_small.dtype
    assert jnp.allclose(out, ref, atol=1e-6, rtol=1e-6), "f32 default mismatch"

    # 2) Larger NCHW input: 2-step parallel grid, non-default gate parameters.
    x_big = jax.random.normal(k2, (4, 8, 96, 96), dtype=jnp.float32)
    out_big = jax.block_until_ready(
        golu_forward(x_big, alpha=0.9, beta=1.1, gamma=0.8))
    ref_big = golu_reference(x_big, alpha=0.9, beta=1.1, gamma=0.8)
    assert jnp.allclose(out_big, ref_big, atol=1e-6, rtol=1e-6), \
        "f32 non-default params mismatch"

    # 3) bf16 input: gate computed in bf16 (matches PyTorch promotion), 2-step grid.
    x_bf16 = jax.random.normal(k3, (2, 8, 32, 32), dtype=jnp.bfloat16)
    out_bf16 = jax.block_until_ready(golu_forward(x_bf16))
    ref_bf16 = golu_reference(x_bf16)
    assert out_bf16.dtype == jnp.bfloat16
    assert jnp.allclose(out_bf16.astype(jnp.float32),
                        ref_bf16.astype(jnp.float32),
                        atol=2e-2, rtol=2e-2), "bf16 mismatch"

    # 4) Lane-unaligned element count (5100 = 39*128 + 108): exercises the
    #    ragged-row block plus the plain-JAX tail path (no pad/unpad copies).
    x_odd = jax.random.normal(k4, (2, 3, 50, 17), dtype=jnp.float32)
    out_odd = jax.block_until_ready(golu_forward(x_odd))
    ref_odd = golu_reference(x_odd)
    assert out_odd.shape == x_odd.shape
    assert jnp.allclose(out_odd, ref_odd, atol=1e-6, rtol=1e-6), \
        "unaligned-size mismatch"

    # TODO(synk): backward pass (_golu_backward*) and the 'tanh' / 'clamp'
    # approximators are not implemented; only the default forward ('exp',
    # identical to 'stable') is.
    print("KERNEL_OK")
</pallas_src>

<mosaic_0001>
module attributes {stable_mosaic.version = 11 : i64} {
  func.func @kernel(%arg0: i32, %arg1: memref<16x128xf32, #tpu.memory_space<vmem>>, %arg2: memref<16x128xf32, #tpu.memory_space<vmem>>) attributes {dimension_semantics = [#tpu.dimension_semantics<parallel>], iteration_bounds = array<i64: 1>, scalar_prefetch = 0 : i64, scratch_operands = 0 : i64, tpu.core_type = #tpu.core_type<tc>, window_params = [{transform_indices = @transform_0, window_bounds = array<i64: 16, 128>}, {transform_indices = @transform_1, window_bounds = array<i64: 16, 128>}]} {
    %c0 = arith.constant 0 : index
    %c0_0 = arith.constant 0 : index
    %0 = vector.load %arg1[%c0, %c0_0] : memref<16x128xf32, #tpu.memory_space<vmem>>, vector<16x128xf32>
    %cst = arith.constant 0.000000e+00 : f32
    %1 = vector.broadcast %cst : f32 to vector<16x128xf32>
    %2 = arith.subf %1, %0 : vector<16x128xf32>
    %3 = math.exp %2 : vector<16x128xf32>
    %cst_1 = arith.constant 0.000000e+00 : f32
    %4 = vector.broadcast %cst_1 : f32 to vector<16x128xf32>
    %5 = arith.subf %4, %3 : vector<16x128xf32>
    %6 = math.exp %5 : vector<16x128xf32>
    %7 = arith.mulf %0, %6 : vector<16x128xf32>
    %c0_2 = arith.constant 0 : index
    %c0_3 = arith.constant 0 : index
    %8 = vector.load %arg2[%c0_2, %c0_3] : memref<16x128xf32, #tpu.memory_space<vmem>>, vector<16x128xf32>
    tpu.vector_store %arg2[%c0_2, %c0_3], %7 {strides = array<i32>} : memref<16x128xf32, #tpu.memory_space<vmem>>, vector<16x128xf32>,
    return
  }
  func.func @transform_0(%arg0: i32) -> (i32, i32) {
    %c0_i32 = arith.constant 0 : i32
    %c0_i32_0 = arith.constant 0 : i32
    return %arg0, %c0_i32 : i32, i32
  }
  func.func @transform_1(%arg0: i32) -> (i32, i32) {
    %c0_i32 = arith.constant 0 : i32
    %c0_i32_0 = arith.constant 0 : i32
    return %arg0, %c0_i32 : i32, i32
  }
}

</mosaic_0001>

<bundles_post_ra>
// kernel: tpu_custom_call.1
= control target key start
LH: loop header
LB: loop body
LE: loop exit
PB: predicated region body
PF: predicated region fallthrough
CT: control target
= control target key end

     0   :  { %6 = vsyncpa [#allocation3], 0  ;;  %s152_s0 = inlined_call_operand.hbm [shape: f32[16,128], index: 0, kind: input, shape index: {}]   ;;  %s153_s1 = inlined_call_operand.hbm [shape: f32[16,128], index: 1, kind: output, shape index: {}]  }
   0x1   :  { %7 = vsyncpa [#allocation4], 0  ;;  %s12_s8 = sshll.u32 %s152_s0, 4  ;;  %s126_s9 = smov [#allocation2]   ;;  %s13_s8 = int_to_ptr.hbm [resolvable:$true] %s12_s8 }
   0x2   :  { %s14_s10 = sshll.u32 %s126_s9, 4  ;;  %s127_s11 = smov 128   ;;  %s15_s10 = int_to_ptr.vmem [resolvable:$true] %s14_s10 }
   0x3   :  { %s128_s12 = smov 8  }
   0x4   :  { %20 = dma.hbm_to_vmem [thread:$0]  %s13_s8, 256, %s15_s10, [#allocation3], %s127_s11, %s127_s11, %s128_s12  }
   0x5   :  { %122 = dma.done.wait [#allocation3], 256  }
   0x6   :  { %123 = vsyncadd [#allocation3], 4294967040  ;;  %v25_v0 = vld [vmem:[#allocation2] sm:$0xff]  ;;  %v26_v1 = vld [vmem:[#allocation2 + $0x8] sm:$0xff]  ;;  %s129_s0 = smov [#allocation5]   ;;  %s49_s16 = sshll.u32 %s153_s1, 4  ;;  %s50_s16 = int_to_ptr.hbm [resolvable:$true] %s49_s16 }
   0x7   :  { %v27_v2 = vsub.f32 0.0, %v25_v0  ;;  %v28_v3 = vsub.f32 0.0, %v26_v1  ;;  %s47_s13 = sshll.u32 %s129_s0, 4  ;;  %s48_s13 = int_to_ptr.vmem [resolvable:$true] %s47_s13 }
   0x9   :  { %v29_v4 = vmul.f32 1.442695, %v27_v2  ;;  %v31_v5 = vmul.f32 1.442695, %v28_v3 }
   0xb   :  { %66 = vpow2.f32 %v29_v4 }
   0xc   :  { %68 = vpow2.f32 %v31_v5 }
  0x11   :  { %v67_v6 = vpop.eup %66 }
  0x12   :  { %v69_v7 = vpop.eup %68  ;;  %v33_v8 = vsub.f32 0.0, %v67_v6 }
  0x13   :  { %v34_v9 = vsub.f32 0.0, %v69_v7 }
  0x14   :  { %v35_v10 = vmul.f32 1.442695, %v33_v8 }
  0x15   :  { %v37_v11 = vmul.f32 1.442695, %v34_v9 }
  0x16   :  { %70 = vpow2.f32 %v35_v10 }
  0x17   :  { %72 = vpow2.f32 %v37_v11 }
  0x1c   :  { %v71_v12 = vpop.eup %70 }
  0x1d   :  { %v73_v13 = vpop.eup %72  ;;  %v39_v14 = vmul.f32 %v71_v12, %v25_v0 }
  0x1e   :  { %v40_v15 = vmul.f32 %v73_v13, %v26_v1 }
  0x1f   :  { %41 = vst [vmem:[#allocation5] sm:$0xff] %v39_v14 }
  0x20   :  { %42 = vst [vmem:[#allocation5 + $0x8] sm:$0xff] %v40_v15 }
  0x21   :  { %55 = dma.vmem_to_hbm [thread:$0]  %s48_s13, 256, %s50_s16, [#allocation4], %s127_s11, %s127_s11, %s128_s12  }
  0x22   :  { %124 = dma.done.wait [#allocation4], 256  }
  0x23   :  { %125 = vsyncadd [#allocation4], 4294967040 }
  0x24   :  { %60 = vsyncpa [#allocation3], 1 }
  0x25   :  { %61 = vsyncpa [#allocation4], 1 }

</bundles_post_ra>
